<compile_context>
chip_gen: v7x
topology: tpu7x:2x2x1
jax: 0.10.0
libtpu: 0.0.40
codegen_flags: <defaults>
</compile_context>

<pallas_src>
import jax
import jax.numpy as jnp
from jax import lax
from jax.experimental import pallas as pl
from jax.experimental.pallas import tpu as pltpu

EPS = 1e-09


# ------------------------------ kernel 1 -------------------------------------
def _iic_accumulate_kernel(z_ref, zt_ref, partial_ref, acc_ref):
    # Grid = (2, kt): axis 0 is the megacore split ("parallel"),
    # axis 1 is the batch-tile reduction ("arbitrary").
    @pl.when(pl.program_id(1) == 0)
    def _init():
        acc_ref[...] = jnp.zeros_like(acc_ref)

    # Contract over the batch-tile dim: (tile_n, C)^T @ (tile_n, C) -> (C, C).
    # Keep inputs in their storage dtype (bf16/f32); accumulate in f32 on MXU.
    acc_ref[...] += lax.dot_general(
        z_ref[...], zt_ref[...],
        dimension_numbers=(((0,), (0,)), ((), ())),
        preferred_element_type=jnp.float32,
    )

    @pl.when(pl.program_id(1) == pl.num_programs(1) - 1)
    def _finalize():
        partial_ref[0] = acc_ref[...]


# ------------------------------ kernel 2 -------------------------------------
def _iic_epilogue_kernel(partial_ref, out_ref):
    # Combine the two per-core partial accumulations.
    P = partial_ref[0] + partial_ref[1]                  # (C, C) f32

    # Symmetrize + normalize with a single scalar divide (no per-element div).
    total = jnp.sum(P)
    scale = 0.5 / total
    P = (P + P.T) * scale

    # P[P < EPS] = EPS
    P = jnp.maximum(P, EPS)

    # Marginals (computed on the clamped P, like the reference).
    Pi = jnp.sum(P, axis=1, keepdims=True)               # (C, 1)
    Pj = jnp.sum(P, axis=0, keepdims=True)               # (1, C)

    # sum(P * (log Pi + log Pj - log P))
    #   == sum_i Pi*log(Pi) + sum_j Pj*log(Pj) - sum(P*log(P))
    loss = (jnp.sum(Pi * jnp.log(Pi))
            + jnp.sum(Pj * jnp.log(Pj))
            - jnp.sum(P * jnp.log(P)))

    out_ref[0, 0] = loss                                 # scalar in SMEM


# ------------------------------ wrapper --------------------------------------
def _make_in_map(kt):
    def idx(h, k):
        return (h * kt + k, 0)
    return idx


def iic_loss(z, zt):
    """z, zt: (N, C) arrays (e.g. softmax outputs). Returns scalar f32 loss."""
    n, c = z.shape
    assert zt.shape == (n, c)
    itemsize = jnp.dtype(z.dtype).itemsize

    # --- pick the batch tile: biggest tile within a conservative VMEM budget
    # (2 inputs x 2 pipeline buffers), multiple of 8, and not bigger than what
    # half the (padded) batch needs. Budget sized for v7x's smaller VMEM.
    budget = 8 * 1024 * 1024
    per_row_bytes = 4 * c * itemsize
    t_budget = max(8, min(1024, (budget // per_row_bytes) // 8 * 8))
    half_rows = -(-n // 2)
    half_rows = -(-half_rows // 8) * 8
    tile_n = int(min(t_budget, half_rows))

    # Pad N to a multiple of 2 * tile_n. Zero rows add nothing to P.
    n_pad = -(-n // (2 * tile_n)) * (2 * tile_n)
    if n_pad != n:
        pad = n_pad - n
        z = jnp.pad(z, ((0, pad), (0, 0)))
        zt = jnp.pad(zt, ((0, pad), (0, 0)))
    kt = n_pad // (2 * tile_n)

    # Explicit VMEM budget: streamed tiles + accumulator + resident output.
    stream_bytes = 4 * tile_n * c * itemsize
    acc_bytes = c * c * 4
    out_bytes = 2 * c * c * 4
    vmem_limit = int(min(64 * 1024 * 1024,
                         max(2 * (stream_bytes + acc_bytes + out_bytes),
                             16 * 1024 * 1024)))

    in_map = _make_in_map(kt)

    partials = pl.pallas_call(
        _iic_accumulate_kernel,
        out_shape=jax.ShapeDtypeStruct((2, c, c), jnp.float32),
        grid_spec=pltpu.PrefetchScalarGridSpec(
            num_scalar_prefetch=0,
            grid=(2, kt),
            in_specs=[
                pl.BlockSpec((tile_n, c), in_map),
                pl.BlockSpec((tile_n, c), in_map),
            ],
            out_specs=pl.BlockSpec((1, c, c), lambda h, k: (h, 0, 0)),
            scratch_shapes=[pltpu.VMEM((c, c), jnp.float32)],
        ),
        compiler_params=pltpu.CompilerParams(
            dimension_semantics=("parallel", "arbitrary"),
            vmem_limit_bytes=vmem_limit,
        ),
        cost_estimate=pl.CostEstimate(
            flops=2 * n_pad * c * c,
            transcendentals=0,
            bytes_accessed=2 * n_pad * c * itemsize + 2 * c * c * 4,
        ),
    )(z, zt)

    loss = pl.pallas_call(
        _iic_epilogue_kernel,
        out_shape=jax.ShapeDtypeStruct((1, 1), jnp.float32),
        in_specs=[pl.BlockSpec((2, c, c), lambda: (0, 0, 0))],
        out_specs=pl.BlockSpec(memory_space=pltpu.MemorySpace.SMEM),
        cost_estimate=pl.CostEstimate(
            flops=8 * c * c,
            transcendentals=c * c + 2 * c,
            bytes_accessed=2 * c * c * 4 + 4,
        ),
    )(partials)
    return loss[0, 0]


# ------------------------------ reference ------------------------------------
def _reference(z, zt):
    # Pure-JAX reference mirroring the PyTorch forward exactly.
    P = jnp.sum(z[:, :, None] * zt[:, None, :], axis=0)
    P = (P + P.T) / 2.0 / jnp.sum(P)
    P = jnp.where(P < EPS, EPS, P)
    C = P.shape[0]
    Pi = jnp.broadcast_to(jnp.sum(P, axis=1).reshape(C, 1), (C, C))
    Pj = jnp.broadcast_to(jnp.sum(P, axis=0).reshape(1, C), (C, C))
    return jnp.sum(P * (jnp.log(Pi) + jnp.log(Pj) - jnp.log(P)))


if __name__ == "__main__":
    N, C = 8, 10  # batch=8, clusters=10 (module default c=10)
    key = jax.random.PRNGKey(0)
    k1, k2 = jax.random.split(key)
    # Typical IIC inputs are softmax probabilities over C clusters.
    z = jax.nn.softmax(jax.random.normal(k1, (N, C), dtype=jnp.float32), axis=-1)
    zt = jax.nn.softmax(jax.random.normal(k2, (N, C), dtype=jnp.float32), axis=-1)

    loss = iic_loss(z, zt)
    jax.block_until_ready(loss)

    ref = _reference(z, zt)
    assert jnp.allclose(loss, ref, rtol=1e-5, atol=1e-6), (loss, ref)

    print("KERNEL_OK")
</pallas_src>

<mosaic_0001>
module attributes {stable_mosaic.version = 11 : i64} {
  func.func @_iic_accumulate_kernel(%arg0: i32, %arg1: i32, %arg2: memref<8x10xf32, #tpu.memory_space<vmem>>, %arg3: memref<8x10xf32, #tpu.memory_space<vmem>>, %arg4: memref<1x10x10xf32, #tpu.memory_space<vmem>>, %arg5: memref<10x10xf32, #tpu.memory_space<vmem>>) attributes {dimension_semantics = [#tpu.dimension_semantics<parallel>, #tpu.dimension_semantics<arbitrary>], iteration_bounds = array<i64: 2, 1>, scalar_prefetch = 0 : i64, scratch_operands = 1 : i64, tpu.core_type = #tpu.core_type<tc>, window_params = [{transform_indices = @transform_0, window_bounds = array<i64: 8, 10>}, {transform_indices = @transform_1, window_bounds = array<i64: 8, 10>}, {transform_indices = @transform_2, window_bounds = array<i64: 1, 10, 10>}]} {
    %c0_i32 = arith.constant 0 : i32
    %0 = arith.cmpi eq, %arg1, %c0_i32 : i32
    %1 = arith.extui %0 : i1 to i32
    %c0_i32_0 = arith.constant 0 : i32
    %2 = arith.cmpi ne, %1, %c0_i32_0 : i32
    scf.if %2 {
      %cst_10 = arith.constant 0.000000e+00 : f32
      %12 = vector.broadcast %cst_10 : f32 to vector<10x10xf32>
      %c0_11 = arith.constant 0 : index
      %c0_12 = arith.constant 0 : index
      %13 = vector.load %arg5[%c0_11, %c0_12] : memref<10x10xf32, #tpu.memory_space<vmem>>, vector<10x10xf32>
      tpu.vector_store %arg5[%c0_11, %c0_12], %12 {strides = array<i32>} : memref<10x10xf32, #tpu.memory_space<vmem>>, vector<10x10xf32>,
    } else {
    }
    %c0 = arith.constant 0 : index
    %c0_1 = arith.constant 0 : index
    %3 = vector.load %arg5[%c0, %c0_1] : memref<10x10xf32, #tpu.memory_space<vmem>>, vector<10x10xf32>
    %c0_2 = arith.constant 0 : index
    %c0_3 = arith.constant 0 : index
    %4 = vector.load %arg2[%c0_2, %c0_3] : memref<8x10xf32, #tpu.memory_space<vmem>>, vector<8x10xf32>
    %c0_4 = arith.constant 0 : index
    %c0_5 = arith.constant 0 : index
    %5 = vector.load %arg3[%c0_4, %c0_5] : memref<8x10xf32, #tpu.memory_space<vmem>>, vector<8x10xf32>
    %cst = arith.constant dense<0.000000e+00> : vector<10x10xf32>
    %6 = tpu.matmul %4, %5, %cst {dimension_numbers = #tpu.dot_dimension_numbers<[0], [0], [1], [1], [0, 1, 1, 1], [], []>} : vector<8x10xf32>, vector<8x10xf32>, vector<10x10xf32> -> vector<10x10xf32>
    %7 = arith.addf %3, %6 : vector<10x10xf32>
    %c0_6 = arith.constant 0 : index
    %c0_7 = arith.constant 0 : index
    %8 = vector.load %arg5[%c0_6, %c0_7] : memref<10x10xf32, #tpu.memory_space<vmem>>, vector<10x10xf32>
    tpu.vector_store %arg5[%c0_6, %c0_7], %7 {strides = array<i32>} : memref<10x10xf32, #tpu.memory_space<vmem>>, vector<10x10xf32>,
    %c0_i32_8 = arith.constant 0 : i32
    %9 = arith.cmpi eq, %arg1, %c0_i32_8 : i32
    %10 = arith.extui %9 : i1 to i32
    %c0_i32_9 = arith.constant 0 : i32
    %11 = arith.cmpi ne, %10, %c0_i32_9 : i32
    scf.if %11 {
      %c0_10 = arith.constant 0 : index
      %c0_11 = arith.constant 0 : index
      %12 = vector.load %arg5[%c0_10, %c0_11] : memref<10x10xf32, #tpu.memory_space<vmem>>, vector<10x10xf32>
      %c0_12 = arith.constant 0 : index
      %c0_13 = arith.constant 0 : index
      %c0_14 = arith.constant 0 : index
      %13 = vector.load %arg4[%c0_12, %c0_13, %c0_14] : memref<1x10x10xf32, #tpu.memory_space<vmem>>, vector<1x10x10xf32>
      %14 = vector.shape_cast %13 : vector<1x10x10xf32> to vector<10x10xf32>
      %15 = vector.shape_cast %12 : vector<10x10xf32> to vector<1x10x10xf32>
      tpu.vector_store %arg4[%c0_12, %c0_13, %c0_14], %15 {strides = array<i32>} : memref<1x10x10xf32, #tpu.memory_space<vmem>>, vector<1x10x10xf32>,
    } else {
    }
    return
  }
  func.func @transform_0(%arg0: i32, %arg1: i32) -> (i32, i32) {
    %c1_i32 = arith.constant 1 : i32
    %0 = arith.muli %arg0, %c1_i32 : i32
    %1 = arith.addi %0, %arg1 : i32
    %c0_i32 = arith.constant 0 : i32
    %c0_i32_0 = arith.constant 0 : i32
    return %1, %c0_i32 : i32, i32
  }
  func.func @transform_1(%arg0: i32, %arg1: i32) -> (i32, i32) {
    %c1_i32 = arith.constant 1 : i32
    %0 = arith.muli %arg0, %c1_i32 : i32
    %1 = arith.addi %0, %arg1 : i32
    %c0_i32 = arith.constant 0 : i32
    %c0_i32_0 = arith.constant 0 : i32
    return %1, %c0_i32 : i32, i32
  }
  func.func @transform_2(%arg0: i32, %arg1: i32) -> (i32, i32, i32) {
    %c0_i32 = arith.constant 0 : i32
    %c0_i32_0 = arith.constant 0 : i32
    %c0_i32_1 = arith.constant 0 : i32
    return %arg0, %c0_i32, %c0_i32_0 : i32, i32, i32
  }
}

</mosaic_0001>

<bundles_post_ra>
// kernel: tpu_custom_call.1
= control target key start
LH: loop header
LB: loop body
LE: loop exit
PB: predicated region body
PF: predicated region fallthrough
CT: control target
= control target key end

     0   :  { %7 = vsyncpa [#allocation4], 0  ;;  %s856_s0 = inlined_call_operand.hbm [shape: f32[16,10], index: 0, kind: input, shape index: {}]   ;;  %s857_s1 = inlined_call_operand.hbm [shape: f32[16,10], index: 1, kind: input, shape index: {}]   ;;  %s858_s2 = inlined_call_operand.vmem [shape: f32[2,10,10], index: 2, kind: output, shape index: {}]  }
   0x1   :  { %9 = vsyncpa [#allocation4 + $0x1], 0 }
   0x2   :  { %10 = vsyncpa [#allocation6], 0 }
   0x3   :  { %12 = vsyncpa [#allocation6 + $0x1], 0  ;;  %s678_s9 = smov 0   ;;  %s680_s10 = smov 0  }
   0x4   :  { %s682_s11 = smov 0   ;;  %s684_s12 = smov 0  }
   0x5   :  { %s686_s13 = smov 0   ;;  %s688_s14 = smov 0  }
   0x6 LB: > { %s457_s15 = sadd.s32 4294967295, %s658_s14   ;;  %s30_s16 = sadd.s32 1, %s654_s13  ;;  %s658_s14 = sphi %s688_s14, %s18_s14   ;;  %s654_s13 = sphi %s686_s13, %s872_s13   ;;  %s650_s12 = sphi %s684_s12, %s871_s12   ;;  %s646_s11 = sphi %s682_s11, %s870_s11   ;;  %s642_s10 = sphi %s680_s10, %s869_s10   ;;  %s638_s9 = sphi %s678_s9, %s868_s9  }
   0x7   : > { %p32_p0 = scmp.ge.s32.totalorder %s30_s16, 2  ;;  %s39_s17 = sadd.s32 1, %s646_s11 }
   0x8   : > { %p46_p1 = scmp.ne.s32.totalorder %s646_s11, %s642_s10  ;;  %p47_p2 = scmp.eq.s32.totalorder %s658_s14, 0 }
   0x9   : > { %s874_s16 = smov (%p32_p0, %s30_s16), 0  ;;  %p52_p4 = scmp.ne.s32.totalorder %s642_s10, %s638_s9 }
   0xa   : > { %p714_p3 = por %p47_p2, %p46_p1  ;;  %s36_s19 = ssub.s32 %s654_s13, %s874_s16 }
   0xb   : > { %p53_p5 = scmp.eq.s32.totalorder %s457_s15, 0  ;;  %p37_p6 = scmp.eq.s32.totalorder %s36_s19, 0 }
   0xc   : > { %p494_p8 = scmp.lt.s32.totalorder %s658_s14, 2  ;;  %s730_s22 = sand.u32 1, %s646_s11  }
   0xd   : > { %p721_p7 = por %p53_p5, %p52_p4  ;;  %s462_s23 = sshll.u32 %s654_s13, 7 }
   0xe   : > { %s727_s21 = scalar_select %p37_p6, %s646_s11, %s39_s17  }
   0xf   : > { %s861_s20 = scalar_select %p721_p7, 1, 0 }
  0x10   : > { %s461_s24 = sshll.u32 %s730_s22, 3  ;;  %s739_s27 = scalar_lea.hbm %s856_s0, %s462_s23 }
  0x11   : > { %s134_s28 = scalar_lea.vmem [#allocation3], %s461_s24  ;;  %p745_p9 = pnand %p494_p8, %p714_p3 }
  0x12   : > { %s142_s29 = sshll.u32 %s134_s28, 4  ;;  %s131_s3 = scalar_lea.sflag [#allocation4], %s730_s22  ;;  %s749_s29 = int_to_ptr.vmem [resolvable:$true] %s142_s29 }
  0x13   : > { %s544_s4 = scalar_lea.hbm %s739_s27, 128  ;;  %p546_p13 = pneg %p745_p9 }
  0x14   : > { %p545_p12 = scmp.ne.s32.totalorder %s739_s27, %s544_s4  ;;  %s549_s7 = scalar_lea.hbm %s856_s0, 256 }
  0x15   : > { %p550_p2 = scmp.lt.u32.totalorder %s739_s27, %s856_s0  ;;  %p551_p3 = scmp.lt.u32.totalorder %s549_s7, %s544_s4 }
  0x16   : > { %p547_p0 = pnand %p546_p13, %p545_p12  ;;  %p553_p5 = scmp.lt.u32.totalorder %s544_s4, %s739_s27 }
  0x17   : > { %p552_p4 = por %p551_p3, %p550_p2 }
  0x18   : > { %p548_p1 = pneg %p547_p0 }
  0x19   : > { %p554_p6 = por %p553_p5, %p552_p4 }
  0x1b   : > { %p555_p8 = pnand %p554_p6, %p548_p1 }
  0x1d   : > { %558 = shalt.err (!%p555_p8)
}
  0x1e   : > { %s559_s15 = scalar_lea.vmem %s749_s29, 128  ;;  %s660_s17 = smov [#allocation3]  }
  0x1f   : > { %p560_p12 = scmp.ne.s32.totalorder %s749_s29, %s559_s15  ;;  %s564_s18 = sshll.u32 %s660_s17, 4  ;;  %s565_s18 = int_to_ptr.vmem [resolvable:$false] %s564_s18 }
  0x20   : > { %s566_s19 = scalar_lea.vmem %s565_s18, 256  ;;  %p567_p11 = scmp.lt.s32.totalorder %s749_s29, %s565_s18 }
  0x21   : > { %p562_p0 = pnand %p560_p12, %p546_p13  ;;  %p568_p2 = scmp.lt.s32.totalorder %s566_s19, %s559_s15 }
  0x23   : > { %p563_p10 = pneg %p562_p0  ;;  %p569_p3 = por %p568_p2, %p567_p11 }
  0x25   : > { %p570_p4 = pnand %p569_p3, %p563_p10 }
  0x27   : > { %573 = shalt.err (!%p570_p4)
}
  0x28   : > { %490 = dma.hbm_to_vmem [thread:$0]  (!%p745_p9), %s739_s27, 128, %s749_s29, %s131_s3  }
  0x29   : > { %p863_p1 = scmp.lt.s32.totalorder %s658_s14, 3  ;;  %p864_p5 = scmp.ge.s32.totalorder %s658_s14, 1 }
  0x2a   : > { %s792_s4 = scalar_lea.hbm %s857_s1, %s462_s23  ;;  %s153_s5 = scalar_lea.vmem [#allocation5], %s461_s24 }
  0x2b   : > { %p783_p6 = pnand %p864_p5, %p863_p1  ;;  %s161_s6 = sshll.u32 %s153_s5, 4  ;;  %s162_s6 = int_to_ptr.vmem [resolvable:$true] %s161_s6 }
  0x2c   : > { %s150_s27 = scalar_lea.sflag [#allocation6], %s730_s22  ;;  %s574_s29 = scalar_lea.hbm %s792_s4, 128 }
  0x2d   : > { %s865_s25 = scalar_select %p783_p6, 1, 0 }
  0x2e   : > { %p575_p10 = scmp.ne.s32.totalorder %s792_s4, %s574_s29  ;;  %s579_s23 = scalar_lea.hbm %s857_s1, 256 }
  0x2f   : > { %p580_p12 = scmp.lt.u32.totalorder %s792_s4, %s857_s1  ;;  %p581_p0 = scmp.lt.u32.totalorder %s579_s23, %s574_s29 }
  0x30   : > { %p577_p11 = pnand %p575_p10, %p546_p13  ;;  %p583_p3 = scmp.lt.u32.totalorder %s574_s29, %s792_s4 }
  0x31   : > { %p582_p2 = por %p581_p0, %p580_p12 }
  0x32   : > { %p578_p8 = pneg %p577_p11 }
  0x33   : > { %p584_p4 = por %p583_p3, %p582_p2 }
  0x35   : > { %p585_p1 = pnand %p584_p4, %p578_p8 }
  0x37   : > { %588 = shalt.err (!%p585_p1)
}
  0x38   : > { %s589_s22 = scalar_lea.vmem %s162_s6, 128  ;;  %s661_s24 = smov [#allocation5]  }
  0x39   : > { %p590_p5 = scmp.ne.s32.totalorder %s162_s6, %s589_s22  ;;  %s594_s15 = sshll.u32 %s661_s24, 4  ;;  %s595_s15 = int_to_ptr.vmem [resolvable:$false] %s594_s15 }
  0x3a   : > { %s596_s17 = scalar_lea.vmem %s595_s15, 256  ;;  %p597_p7 = scmp.lt.s32.totalorder %s162_s6, %s595_s15 }
  0x3b   : > { %p592_p10 = pnand %p590_p5, %p546_p13  ;;  %p598_p6 = scmp.lt.s32.totalorder %s596_s17, %s589_s22 }
  0x3d   : > { %p593_p11 = pneg %p592_p10  ;;  %p599_p0 = por %p598_p6, %p597_p7 }
  0x3f   : > { %p600_p12 = pnand %p599_p0, %p593_p11 }
  0x41   : > { %603 = shalt.err (!%p600_p12)
}
  0x42   : > { %493 = dma.hbm_to_vmem [thread:$0]  (!%p745_p9), %s792_s4, 128, %s162_s6, %s150_s27  }
  0x43   : > { %p866_p8 = scmp.ne.s32.totalorder %s865_s25, 0 }
  0x44   : > { %s172_s18 = sand.u32 (!%p866_p8), 1, %s642_s10   ;;  %p867_p13 = scmp.ne.s32.totalorder (!%p866_p8), %s861_s20, 0 }
  0x45   : > { %170 = sbr.rel (%p866_p8) target bundleno = 437 (0x1b5), region = 28  ;;  %s466_s19 = sshll.u32 (!%p866_p8), %s172_s18, 3 }
  0x46   : > { %s173_s26 = scalar_lea.sflag (!%p866_p8), [#allocation4], %s172_s18  ;;  %s176_s28 = scalar_lea.vmem (!%p866_p8), [#allocation3], %s466_s19 }
  0x4c   : > { %629 = dma.done.wait (%p867_p13), %s173_s26, 128  }
  0x4d   : > { %631 = vsyncadd (%p867_p13), %s173_s26, 4294967168  ;;  %s182_s5 = scalar_lea.sflag [#allocation6], %s172_s18  ;;  %s185_s29 = scalar_lea.vmem [#allocation5], %s466_s19 }
  0x4e   : > { %633 = dma.done.wait (%p867_p13), %s182_s5, 128  }
  0x4f   : > { %635 = vsyncadd (%p867_p13), %s182_s5, 4294967168  ;;  %v228_v0 = vld [vmem:[%s176_s28] sm:$0xff]  ;;  %v229_v1 = vld [vmem:[%s185_s29] sm:$0xff]  ;;  %vm224_vm0 = vcmask 74752   ;;  %v662_v2 = vmov 0.0   ;;  %vm262_vm1 = vcmask 64512  }
  0x50   : > { %230 = vxpose.xlu0.b32.start.end [1/1] (short) (narrow) %v228_v0, 16  ;;  %478 = vmatprep.subr.mxu0 %v229_v1  ;;  %225 = vst.msk [vmem:[#allocation2 + $0x8] sm:$0x3] %vm224_vm0, %v662_v2  ;;  %vm222_vm2 = vcmask 80896   ;;  %p213_p7 = scmp.lt.s32.totalorder %s650_s12, 1 }
  0x51   : > { %479 = vmatpush3.msra.mxu0 %v229_v1  ;;  %223 = vst.msk [vmem:[#allocation2] sm:$0xff] %vm222_vm2, %v662_v2 }
  0x52   : > { %s876_s12 = smov (!%p213_p7, %s650_s12), 1 }
  0x53   : > { %s474_s20 = sshll.u32 %s876_s12, 4 }
  0x54   : > { %s217_s4 = scalar_lea.vmem %s858_s2, %s474_s20 }
  0x57   : > { %v227_v5 = vld [vmem:[#allocation2 + $0x8] sm:$0x3] }
  0x58   : > { %v226_v6 = vld [vmem:[#allocation2] sm:$0xff] }
  0xd0   : > { %v246_v3 = vpop.trf.xlu0 }
  0xd1   : > { %480 = vmatprep.mubr.msk.f32.mxu0 %vm262_vm1, %v246_v3 }
  0xd4   : > { %v247_v4 = vpop.trf.xlu0 }
  0xd5   : > { %481 = vmatmul.mubr.msk.f32.vlgmr.msra.gmra.mrb[0].mxu0 %vm262_vm1, %v247_v4 }
 0x1a8   : > { %v482_v7 = vpop.f32.mrb[0].mxu0 }
 0x1a9   : > { %v345_v8 = vadd.f32 %v482_v7, %v227_v5  ;;  %v335_v9 = vpop.f32.mrb[1].mxu0 }
 0x1aa   : > { %v344_v10 = vadd.f32 %v335_v9, %v226_v6 }
 0x1ab   : > { %349 = vst.msk [vmem:[#allocation2 + $0x8] sm:$0x3] %vm224_vm0, %v345_v8 }
 0x1ac   : > { %347 = vst.msk [vmem:[#allocation2] sm:$0xff] %vm222_vm2, %v344_v10 }
 0x1b2   : > { %v354_v11 = vld [vmem:[#allocation2 + $0x8] sm:$0x3] }
 0x1b3   : > { %356 = vst.msk [vmem:[%s217_s4 + $0x8] sm:$0x3] %vm224_vm0, %v354_v11  ;;  %v353_v12 = vld [vmem:[#allocation2] sm:$0xff] }
 0x1b4   : > { %355 = vst.msk [vmem:[%s217_s4] sm:$0xff] %vm222_vm2, %v353_v12 }
 0x1b5 PF: > { %s18_s14 = sadd.s32 1, %s658_s14   ;;  %s868_s9 = smov %s642_s10 }
 0x1b6   : > { %p15_p9 = scmp.ge.s32.totalorder %s18_s14, 4   ;;  %s869_s10 = smov %s646_s11 }
 0x1b7   : > { %s870_s11 = smov %s727_s21  ;;  %s871_s12 = smov %s654_s13 }
 0x1b8   : > { %s872_s13 = smov %s874_s16  ;;  %17 = sbr.rel (!%p15_p9) target bundleno = 6 (0x6), region = 89 }
 0x1bf   :  { %378 = vsyncpa [#allocation4], 1 }
 0x1c0   :  { %380 = vsyncpa [#allocation4 + $0x1], 1 }
 0x1c1   :  { %381 = vsyncpa [#allocation6], 1 }
 0x1c2   :  { %383 = vsyncpa [#allocation6 + $0x1], 1 }

</bundles_post_ra>
